<compile_context>
chip_gen: v5e
topology: v5e:2x2
jax: 0.10.0
libtpu: 0.0.40
codegen_flags: <defaults>
</compile_context>

<pallas_src>
import functools

import jax
import jax.numpy as jnp
from jax.experimental import pallas as pl
from jax.experimental.pallas import tpu as pltpu


def mlp_kernel(x_ref,
               w1_ref, b1_ref,
               w2_ref, b2_ref,
               w3_ref, b3_ref,
               w4_ref, b4_ref,
               o_ref,
               *, compute_dtype):
    x = x_ref[...].astype(compute_dtype)                                # (TB, 19)

    # Weights are already in compute_dtype (bf16 by default); accumulate in f32.
    h = jnp.dot(x, w1_ref[...], preferred_element_type=jnp.float32)     # (TB, 256)
    h = jnp.maximum(h + b1_ref[...], 0.0).astype(compute_dtype)         # ReLU (+ eval dropout = identity)

    h = jnp.dot(h, w2_ref[...], preferred_element_type=jnp.float32)     # (TB, 128) = 64 real + 64 zero-pad
    h = jnp.maximum(h + b2_ref[...], 0.0).astype(compute_dtype)

    h = jnp.dot(h, w3_ref[...], preferred_element_type=jnp.float32)     # (TB, 128) = 16 real + 112 zero-pad
    h = jnp.maximum(h + b3_ref[...], 0.0).astype(compute_dtype)

    logits = jnp.dot(h, w4_ref[...],
                     preferred_element_type=jnp.float32) + b4_ref[...]  # (TB, 8) = 2 real + 6 zero-pad

    # Sigmoid on the narrow output only: exp + approximate reciprocal -> EUP slot.
    o_ref[...] = pl.reciprocal(1.0 + jnp.exp(-logits), approx=True)


def _cdiv(a, b):
    return -(-a // b)


def _round_up(n, m):
    return _cdiv(n, m) * m


def _pad_to(a, shape):
    return jnp.pad(a, [(0, t - s) for s, t in zip(a.shape, shape)])


def net_forward(x, params, *, block_b=2048, compute_dtype=jnp.bfloat16):
    """Forward pass of Net. x: (B, 19) float32 -> (B, 2) float32."""
    (w1, b1), (w2, b2), (w3, b3), (w4, b4) = params
    B, F = x.shape
    assert F == 19

    # Zero-pad narrow layers to lane-dense widths (exact math) and pre-cast the
    # weights to the compute dtype so the resident VMEM copies are half-size and
    # the MXU runs its native bf16 path.  Biases stay f32 (added post-accumulate).
    w1c = w1.astype(compute_dtype)
    w2p = _pad_to(w2, (256, 128)).astype(compute_dtype)
    w3p = _pad_to(w3, (128, 128)).astype(compute_dtype)
    w4p = _pad_to(w4, (128, 8)).astype(compute_dtype)
    b1c = b1.astype(jnp.float32)
    b2p = _pad_to(b2, (1, 128)).astype(jnp.float32)
    b3p = _pad_to(b3, (1, 128)).astype(jnp.float32)
    b4p = _pad_to(b4, (1, 8)).astype(jnp.float32)

    # Batch tile: balance rows across steps (avoids a wasted full extra step when
    # B is just over block_b) and target >= 8 grid steps for large B so the
    # "parallel" grid axis can be sharded across v7x's two TensorCores.
    n_steps = max(_cdiv(B, block_b), min(8, max(1, B // 256)))
    TB = _round_up(_cdiv(B, n_steps), 8)
    Bp = _round_up(B, TB)
    xp = x if Bp == B else jnp.pad(x, ((0, Bp - B), (0, 0)))
    grid = (Bp // TB,)

    const = lambda i: (0, 0)   # weights: same block every step -> resident in VMEM

    weight_bytes = sum(int(a.size) * a.dtype.itemsize
                       for a in (w1c, b1c, w2p, b2p, w3p, b3p, w4p, b4p))
    cost = pl.CostEstimate(
        flops=2 * Bp * (19 * 256 + 256 * 128 + 128 * 128 + 128 * 8),
        transcendentals=Bp * 8,
        bytes_accessed=int(xp.size) * 4 + Bp * 8 * 4 + weight_bytes,
    )

    out = pl.pallas_call(
        functools.partial(mlp_kernel, compute_dtype=compute_dtype),
        out_shape=jax.ShapeDtypeStruct((Bp, 8), jnp.float32),
        grid=grid,
        in_specs=[
            pl.BlockSpec((TB, 19), lambda i: (i, 0)),     # x, streamed per batch tile
            pl.BlockSpec((19, 256), const), pl.BlockSpec((1, 256), const),
            pl.BlockSpec((256, 128), const), pl.BlockSpec((1, 128), const),
            pl.BlockSpec((128, 128), const), pl.BlockSpec((1, 128), const),
            pl.BlockSpec((128, 8), const), pl.BlockSpec((1, 8), const),
        ],
        out_specs=pl.BlockSpec((TB, 8), lambda i: (i, 0)),
        compiler_params=pltpu.CompilerParams(
            dimension_semantics=("parallel",),            # megacore sharding on v7x
            vmem_limit_bytes=32 * 1024 * 1024,            # safe on v5e/v7x; raise on v6e
        ),
        cost_estimate=cost,
    )(xp, w1c, b1c, w2p, b2p, w3p, b3p, w4p, b4p)

    return out[:B, :2]


def init_params(key):
    """Deterministic init, PyTorch nn.Linear-style U(-1/sqrt(fan_in), 1/sqrt(fan_in))."""
    dims = [(19, 256), (256, 64), (64, 16), (16, 2)]
    params = []
    for fan_in, fan_out in dims:
        key, kw, kb = jax.random.split(key, 3)
        bound = 1.0 / jnp.sqrt(fan_in)
        w = jax.random.uniform(kw, (fan_in, fan_out), jnp.float32, -bound, bound)
        b = jax.random.uniform(kb, (1, fan_out), jnp.float32, -bound, bound)
        params.append((w, b))
    return params


def reference_forward(x, params):
    h = x
    for i, (w, b) in enumerate(params):
        h = h @ w + b
        if i < 3:
            h = jnp.maximum(h, 0.0)
    return jax.nn.sigmoid(h)


if __name__ == "__main__":
    key = jax.random.PRNGKey(0)
    key, kx = jax.random.split(key)

    B = 30                                    # deliberately not a multiple of 8
    x = jax.random.normal(kx, (B, 19), jnp.float32)
    params = init_params(key)
    ref = reference_forward(x, params)

    # Default config: bf16 compute, single grid step at this small batch.
    out = jax.block_until_ready(net_forward(x, params))
    assert out.shape == (B, 2), out.shape
    # Tolerance covers bf16 weight/activation rounding + EUP approx reciprocal.
    assert jnp.allclose(out, ref, atol=2e-2, rtol=2e-2), "mismatch vs reference (bf16, default tile)"

    # f32 compute path at tighter tolerance (only approx-reciprocal error remains).
    out_f32 = jax.block_until_ready(net_forward(x, params, compute_dtype=jnp.float32))
    assert jnp.allclose(out_f32, ref, atol=5e-3, rtol=5e-3), "mismatch vs reference (f32)"

    # Small tile to exercise the multi-step batch grid + ragged-tail padding.
    out2 = jax.block_until_ready(net_forward(x, params, block_b=8))
    assert out2.shape == (B, 2), out2.shape
    assert jnp.allclose(out2, ref, atol=2e-2, rtol=2e-2), "mismatch vs reference (tiled grid)"

    print("KERNEL_OK")
</pallas_src>

<mosaic_0001>
module attributes {stable_mosaic.version = 11 : i64} {
  func.func @mlp_kernel(%arg0: i32, %arg1: memref<32x19xf32, #tpu.memory_space<vmem>>, %arg2: memref<19x256xbf16, #tpu.memory_space<vmem>>, %arg3: memref<1x256xf32, #tpu.memory_space<vmem>>, %arg4: memref<256x128xbf16, #tpu.memory_space<vmem>>, %arg5: memref<1x128xf32, #tpu.memory_space<vmem>>, %arg6: memref<128x128xbf16, #tpu.memory_space<vmem>>, %arg7: memref<1x128xf32, #tpu.memory_space<vmem>>, %arg8: memref<128x8xbf16, #tpu.memory_space<vmem>>, %arg9: memref<1x8xf32, #tpu.memory_space<vmem>>, %arg10: memref<32x8xf32, #tpu.memory_space<vmem>>) attributes {dimension_semantics = [#tpu.dimension_semantics<parallel>], iteration_bounds = array<i64: 1>, scalar_prefetch = 0 : i64, scratch_operands = 0 : i64, tpu.core_type = #tpu.core_type<tc>, window_params = [{transform_indices = @transform_0, window_bounds = array<i64: 32, 19>}, {pipeline_mode = #tpu.pipeline_mode<synchronous>, transform_indices = @transform_1, window_bounds = array<i64: 19, 256>}, {pipeline_mode = #tpu.pipeline_mode<synchronous>, transform_indices = @transform_2, window_bounds = array<i64: 1, 256>}, {pipeline_mode = #tpu.pipeline_mode<synchronous>, transform_indices = @transform_3, window_bounds = array<i64: 256, 128>}, {pipeline_mode = #tpu.pipeline_mode<synchronous>, transform_indices = @transform_4, window_bounds = array<i64: 1, 128>}, {pipeline_mode = #tpu.pipeline_mode<synchronous>, transform_indices = @transform_5, window_bounds = array<i64: 128, 128>}, {pipeline_mode = #tpu.pipeline_mode<synchronous>, transform_indices = @transform_6, window_bounds = array<i64: 1, 128>}, {pipeline_mode = #tpu.pipeline_mode<synchronous>, transform_indices = @transform_7, window_bounds = array<i64: 128, 8>}, {pipeline_mode = #tpu.pipeline_mode<synchronous>, transform_indices = @transform_8, window_bounds = array<i64: 1, 8>}, {transform_indices = @transform_9, window_bounds = array<i64: 32, 8>}]} {
    %c0 = arith.constant 0 : index
    %c0_0 = arith.constant 0 : index
    %0 = vector.load %arg1[%c0, %c0_0] : memref<32x19xf32, #tpu.memory_space<vmem>>, vector<32x19xf32>
    %1 = arith.truncf %0 : vector<32x19xf32> to vector<32x19xbf16>
    %c0_1 = arith.constant 0 : index
    %c0_2 = arith.constant 0 : index
    %2 = vector.load %arg2[%c0_1, %c0_2] : memref<19x256xbf16, #tpu.memory_space<vmem>>, vector<19x256xbf16>
    %cst = arith.constant dense<0.000000e+00> : vector<32x256xf32>
    %3 = tpu.matmul %1, %2, %cst {dimension_numbers = #tpu.dot_dimension_numbers<[1], [0], [0], [1], [0, 0, 1, 1], [], []>} : vector<32x19xbf16>, vector<19x256xbf16>, vector<32x256xf32> -> vector<32x256xf32>
    %c0_3 = arith.constant 0 : index
    %c0_4 = arith.constant 0 : index
    %4 = vector.load %arg3[%c0_3, %c0_4] : memref<1x256xf32, #tpu.memory_space<vmem>>, vector<1x256xf32>
    %5 = vector.broadcast %4 : vector<1x256xf32> to vector<32x256xf32>
    %6 = arith.addf %3, %5 : vector<32x256xf32>
    %cst_5 = arith.constant 0.000000e+00 : f32
    %7 = vector.broadcast %cst_5 : f32 to vector<32x256xf32>
    %8 = arith.maximumf %6, %7 : vector<32x256xf32>
    %9 = arith.truncf %8 : vector<32x256xf32> to vector<32x256xbf16>
    %c0_6 = arith.constant 0 : index
    %c0_7 = arith.constant 0 : index
    %10 = vector.load %arg4[%c0_6, %c0_7] : memref<256x128xbf16, #tpu.memory_space<vmem>>, vector<256x128xbf16>
    %cst_8 = arith.constant dense<0.000000e+00> : vector<32x128xf32>
    %11 = tpu.matmul %9, %10, %cst_8 {dimension_numbers = #tpu.dot_dimension_numbers<[1], [0], [0], [1], [0, 0, 1, 1], [], []>} : vector<32x256xbf16>, vector<256x128xbf16>, vector<32x128xf32> -> vector<32x128xf32>
    %c0_9 = arith.constant 0 : index
    %c0_10 = arith.constant 0 : index
    %12 = vector.load %arg5[%c0_9, %c0_10] : memref<1x128xf32, #tpu.memory_space<vmem>>, vector<1x128xf32>
    %13 = vector.broadcast %12 : vector<1x128xf32> to vector<32x128xf32>
    %14 = arith.addf %11, %13 : vector<32x128xf32>
    %cst_11 = arith.constant 0.000000e+00 : f32
    %15 = vector.broadcast %cst_11 : f32 to vector<32x128xf32>
    %16 = arith.maximumf %14, %15 : vector<32x128xf32>
    %17 = arith.truncf %16 : vector<32x128xf32> to vector<32x128xbf16>
    %c0_12 = arith.constant 0 : index
    %c0_13 = arith.constant 0 : index
    %18 = vector.load %arg6[%c0_12, %c0_13] : memref<128x128xbf16, #tpu.memory_space<vmem>>, vector<128x128xbf16>
    %cst_14 = arith.constant dense<0.000000e+00> : vector<32x128xf32>
    %19 = tpu.matmul %17, %18, %cst_14 {dimension_numbers = #tpu.dot_dimension_numbers<[1], [0], [0], [1], [0, 0, 1, 1], [], []>} : vector<32x128xbf16>, vector<128x128xbf16>, vector<32x128xf32> -> vector<32x128xf32>
    %c0_15 = arith.constant 0 : index
    %c0_16 = arith.constant 0 : index
    %20 = vector.load %arg7[%c0_15, %c0_16] : memref<1x128xf32, #tpu.memory_space<vmem>>, vector<1x128xf32>
    %21 = vector.broadcast %20 : vector<1x128xf32> to vector<32x128xf32>
    %22 = arith.addf %19, %21 : vector<32x128xf32>
    %cst_17 = arith.constant 0.000000e+00 : f32
    %23 = vector.broadcast %cst_17 : f32 to vector<32x128xf32>
    %24 = arith.maximumf %22, %23 : vector<32x128xf32>
    %25 = arith.truncf %24 : vector<32x128xf32> to vector<32x128xbf16>
    %c0_18 = arith.constant 0 : index
    %c0_19 = arith.constant 0 : index
    %26 = vector.load %arg8[%c0_18, %c0_19] : memref<128x8xbf16, #tpu.memory_space<vmem>>, vector<128x8xbf16>
    %cst_20 = arith.constant dense<0.000000e+00> : vector<32x8xf32>
    %27 = tpu.matmul %25, %26, %cst_20 {dimension_numbers = #tpu.dot_dimension_numbers<[1], [0], [0], [1], [0, 0, 1, 1], [], []>} : vector<32x128xbf16>, vector<128x8xbf16>, vector<32x8xf32> -> vector<32x8xf32>
    %c0_21 = arith.constant 0 : index
    %c0_22 = arith.constant 0 : index
    %28 = vector.load %arg9[%c0_21, %c0_22] : memref<1x8xf32, #tpu.memory_space<vmem>>, vector<1x8xf32>
    %29 = vector.broadcast %28 : vector<1x8xf32> to vector<32x8xf32>
    %30 = arith.addf %27, %29 : vector<32x8xf32>
    %cst_23 = arith.constant 0.000000e+00 : f32
    %31 = vector.broadcast %cst_23 : f32 to vector<32x8xf32>
    %32 = arith.subf %31, %30 : vector<32x8xf32>
    %33 = math.exp %32 : vector<32x8xf32>
    %cst_24 = arith.constant 1.000000e+00 : f32
    %34 = vector.broadcast %cst_24 : f32 to vector<32x8xf32>
    %35 = arith.addf %34, %33 : vector<32x8xf32>
    %36 = tpu.reciprocal %35 {approx = true} : vector<32x8xf32> -> vector<32x8xf32>
    %c0_25 = arith.constant 0 : index
    %c0_26 = arith.constant 0 : index
    %37 = vector.load %arg10[%c0_25, %c0_26] : memref<32x8xf32, #tpu.memory_space<vmem>>, vector<32x8xf32>
    tpu.vector_store %arg10[%c0_25, %c0_26], %36 {strides = array<i32>} : memref<32x8xf32, #tpu.memory_space<vmem>>, vector<32x8xf32>,
    return
  }
  func.func @transform_0(%arg0: i32) -> (i32, i32) {
    %c0_i32 = arith.constant 0 : i32
    %c0_i32_0 = arith.constant 0 : i32
    return %arg0, %c0_i32 : i32, i32
  }
  func.func @transform_1(%arg0: i32) -> (i32, i32) {
    %c0_i32 = arith.constant 0 : i32
    %c0_i32_0 = arith.constant 0 : i32
    %c0_i32_1 = arith.constant 0 : i32
    return %c0_i32, %c0_i32_0 : i32, i32
  }
  func.func @transform_2(%arg0: i32) -> (i32, i32) {
    %c0_i32 = arith.constant 0 : i32
    %c0_i32_0 = arith.constant 0 : i32
    %c0_i32_1 = arith.constant 0 : i32
    return %c0_i32, %c0_i32_0 : i32, i32
  }
  func.func @transform_3(%arg0: i32) -> (i32, i32) {
    %c0_i32 = arith.constant 0 : i32
    %c0_i32_0 = arith.constant 0 : i32
    %c0_i32_1 = arith.constant 0 : i32
    return %c0_i32, %c0_i32_0 : i32, i32
  }
  func.func @transform_4(%arg0: i32) -> (i32, i32) {
    %c0_i32 = arith.constant 0 : i32
    %c0_i32_0 = arith.constant 0 : i32
    %c0_i32_1 = arith.constant 0 : i32
    return %c0_i32, %c0_i32_0 : i32, i32
  }
  func.func @transform_5(%arg0: i32) -> (i32, i32) {
    %c0_i32 = arith.constant 0 : i32
    %c0_i32_0 = arith.constant 0 : i32
    %c0_i32_1 = arith.constant 0 : i32
    return %c0_i32, %c0_i32_0 : i32, i32
  }
  func.func @transform_6(%arg0: i32) -> (i32, i32) {
    %c0_i32 = arith.constant 0 : i32
    %c0_i32_0 = arith.constant 0 : i32
    %c0_i32_1 = arith.constant 0 : i32
    return %c0_i32, %c0_i32_0 : i32, i32
  }
  func.func @transform_7(%arg0: i32) -> (i32, i32) {
    %c0_i32 = arith.constant 0 : i32
    %c0_i32_0 = arith.constant 0 : i32
    %c0_i32_1 = arith.constant 0 : i32
    return %c0_i32, %c0_i32_0 : i32, i32
  }
  func.func @transform_8(%arg0: i32) -> (i32, i32) {
    %c0_i32 = arith.constant 0 : i32
    %c0_i32_0 = arith.constant 0 : i32
    %c0_i32_1 = arith.constant 0 : i32
    return %c0_i32, %c0_i32_0 : i32, i32
  }
  func.func @transform_9(%arg0: i32) -> (i32, i32) {
    %c0_i32 = arith.constant 0 : i32
    %c0_i32_0 = arith.constant 0 : i32
    return %arg0, %c0_i32 : i32, i32
  }
}

</mosaic_0001>

<bundles_post_ra>
// kernel: tpu_custom_call.1
= control target key start
LH: loop header
LB: loop body
LE: loop exit
PB: predicated region body
PF: predicated region fallthrough
CT: control target
= control target key end

     0   :  { %14 = vsyncpa [#allocation3], 0  ;;  %s755_s12 = smov [#allocation2]   ;;  %s756_s14 = smov 64   ;;  %s915_s0 = inlined_call_operand.vmem [shape: f32[32,19], index: 0, kind: input, shape index: {}]   ;;  %s916_s1 = inlined_call_operand.vmem [shape: bf16[19,256], index: 1, kind: input, shape index: {}]   ;;  %s917_s2 = inlined_call_operand.vmem [shape: f32[1,256], index: 2, kind: input, shape index: {}]   ;;  %s918_s3 = inlined_call_operand.hbm [shape: bf16[256,128], index: 3, kind: input, shape index: {}]   ;;  %s919_s4 = inlined_call_operand.vmem [shape: f32[1,128], index: 4, kind: input, shape index: {}]   ;;  %s920_s5 = inlined_call_operand.vmem [shape: bf16[128,128], index: 5, kind: input, shape index: {}]   ;;  %s921_s6 = inlined_call_operand.vmem [shape: f32[1,128], index: 6, kind: input, shape index: {}]   ;;  %s922_s7 = inlined_call_operand.vmem [shape: bf16[128,8], index: 7, kind: input, shape index: {}]   ;;  %s923_s8 = inlined_call_operand.vmem [shape: f32[1,8], index: 8, kind: input, shape index: {}]   ;;  %s924_s9 = inlined_call_operand.vmem [shape: f32[32,8], index: 9, kind: output, shape index: {}]  }
   0x1   :  { %s25_s11 = sshll.u32 %s918_s3, 4  ;;  %s27_s13 = sshll.u32 %s755_s12, 4  ;;  %s26_s11 = int_to_ptr.hbm [resolvable:$true] %s25_s11  ;;  %s28_s13 = int_to_ptr.vmem [resolvable:$true] %s27_s13 }
   0x2   :  { %s757_s15 = smov 4  }
   0x3   :  { %33 = dma.hbm_to_vmem [thread:$0]  %s26_s11, 2048, %s28_s13, [#allocation3], %s756_s14, %s756_s14, %s757_s15  }
   0x4   :  { %753 = dma.done.wait [#allocation3], 2048  }
   0x5   :  { %754 = vsyncadd [#allocation3], 4294965248  ;;  %vm86_vm0 = vcmask 1040384   ;;  %vm87_vm1 = vcmask 1041408   ;;  %v758_v0 = vmov 65535   ;;  %v681_v9 = vld [vmem:[#allocation2 + $0x38] sm:$0xff] }
   0x6   :  { %v88_v1 = vsel %vm86_vm0, 4294967295, %v758_v0  ;;  %v57_v2 = vld [vmem:[%s916_s1 + $0x10] sm:$0x33]  ;;  %v534_v8 = vld [vmem:[%s916_s1] sm:$0xf]  ;;  %v689_v10 = vld [vmem:[#allocation2 + $0x78] sm:$0xff]  ;;  %278 = vmatpush.bf16.msra.mxu2 %v681_v9 }
   0x7   :  { %v71_v3 = vunpack.c.l.b16 %v57_v2  ;;  %v72_v4 = vunpack.c.h.b16 %v57_v2  ;;  %v89_v5 = vsel %vm87_vm1, %v88_v1, 0  ;;  %v673_v11 = vld [vmem:[%s916_s1 + $0x4] sm:$0xf0]  ;;  %v672_v12 = vld [vmem:[%s916_s1 + $0x4] sm:$0xf]  ;;  %297 = vmatpush.bf16.msra.mxu3 %v689_v10  ;;  %v680_v16 = vld [vmem:[#allocation2 + $0x30] sm:$0xff] }
   0x8   :  { %v536_v13 = vld [vmem:[%s916_s1 + $0x8] sm:$0xf0]  ;;  %v688_v17 = vld [vmem:[#allocation2 + $0x70] sm:$0xff]  ;;  %v535_v18 = vor.u32 %v673_v11, %v534_v8  ;;  %v49_v20 = vld [vmem:[%s915_s0] sm:$0xff]  ;;  %vm79_vm2 = vcmask 154624   ;;  %vm522_vm3 = vcmask 64512  }
   0x9   :  { %v75_v6 = vpack.c.b16 %v71_v3, %v71_v3  ;;  %v76_v7 = vpack.c.b16 %v72_v4, %v72_v4  ;;  %v539_v19 = vor.u32 %v672_v12, %v536_v13  ;;  %v50_v21 = vld [vmem:[%s915_s0 + $0x8] sm:$0xff]  ;;  %v678_v25 = vld [vmem:[#allocation2 + $0x20] sm:$0xff]  ;;  %v51_v27 = vld [vmem:[%s915_s0 + $0x10] sm:$0xff] }
   0xa   :  { %279 = vmatpush.bf16.msra.mxu2 %v680_v16  ;;  %v679_v22 = vld [vmem:[#allocation2 + $0x28] sm:$0xff]  ;;  %v53_v24 = vpack.c.bf16 %v50_v21, %v49_v20  ;;  %v686_v26 = vld [vmem:[#allocation2 + $0x60] sm:$0xff]  ;;  %v52_v28 = vld [vmem:[%s915_s0 + $0x18] sm:$0xff] }
   0xb   :  { %v91_v14 = vand.u32 %v89_v5, %v75_v6  ;;  %v94_v15 = vand.u32 %v89_v5, %v76_v7  ;;  %298 = vmatpush.bf16.msra.mxu3 %v688_v17  ;;  %v687_v23 = vld [vmem:[#allocation2 + $0x68] sm:$0xff]  ;;  %v54_v29 = vpack.c.bf16 %v52_v28, %v51_v27  ;;  %v677_v30 = vld [vmem:[#allocation2 + $0x18] sm:$0xff]  ;;  %v676_v32 = vld [vmem:[#allocation2 + $0x10] sm:$0xff] }
   0xc   :  { %v685_v31 = vld [vmem:[#allocation2 + $0x58] sm:$0xff]  ;;  %v684_v33 = vld [vmem:[#allocation2 + $0x50] sm:$0xff]  ;;  %v675_v34 = vld [vmem:[#allocation2 + $0x8] sm:$0xff] }
   0xd   :  { %102 = vmatpush.bf16.msra.mxu0 %v91_v14  ;;  %121 = vmatpush.bf16.msra.mxu1 %v94_v15  ;;  %v683_v35 = vld [vmem:[#allocation2 + $0x48] sm:$0xff]  ;;  %v674_v36 = vld [vmem:[#allocation2] sm:$0xff]  ;;  %v697_v38 = vld [vmem:[%s920_s5 + $0x38] sm:$0xff] }
   0xe   :  { %280 = vmatpush.bf16.msra.mxu2 %v679_v22  ;;  %v682_v37 = vld [vmem:[#allocation2 + $0x40] sm:$0xff]  ;;  %v696_v42 = vld [vmem:[%s920_s5 + $0x30] sm:$0xff]  ;;  %v695_v45 = vld [vmem:[%s920_s5 + $0x28] sm:$0xff] }
   0xf   :  { %299 = vmatpush.bf16.msra.mxu3 %v687_v23  ;;  %v58_v39 = vld [vmem:[%s917_s2] sm:$0x3]  ;;  %v693_v9 = vld [vmem:[%s920_s5 + $0x18] sm:$0xff]  ;;  %v692_v10 = vld [vmem:[%s920_s5 + $0x10] sm:$0xff] }
  0x10   :  { %v60_v43 = vperm.slane %v58_v39, 0  ;;  %v61_v44 = vperm.slane %v58_v39, 1  ;;  %v694_v52 = vld [vmem:[%s920_s5 + $0x20] sm:$0xff]  ;;  %v691_v11 = vld [vmem:[%s920_s5 + $0x8] sm:$0xff]  ;;  %v705_v16 = vld [vmem:[%s922_s7 + $0x38] sm:$0xff] }
  0x11   :  { %103 = vmatpush.bf16.msra.mxu0 %v535_v18  ;;  %122 = vmatpush.bf16.msra.mxu1 %v539_v19  ;;  %v690_v12 = vld [vmem:[%s920_s5] sm:$0xff]  ;;  %v704_v17 = vld [vmem:[%s922_s7 + $0x30] sm:$0xff]  ;;  %v703_v19 = vld [vmem:[%s922_s7 + $0x28] sm:$0xff] }
  0x12   :  { %281 = vmatpush.bf16.msra.mxu2 %v678_v25  ;;  %v710_v15 = vld [vmem:[%s919_s4] ss:$0 sm:$0xff] }
  0x13   :  { %300 = vmatpush.bf16.msra.mxu3 %v686_v26  ;;  %v702_v25 = vld [vmem:[%s922_s7 + $0x20] sm:$0xff] }
  0x14   :  { %540 = vmatmul.msk.bf16.vlgmr.msra.gmra.mxu0 %vm79_vm2, %v53_v24  ;;  %542 = vmatmul.msk.bf16.vlgmr.msra.gmra.mxu1 %vm79_vm2, %v53_v24 }
  0x15   :  { %390 = vmatpush.bf16.msrb.mxu0 %v697_v38  ;;  %483 = vmatpush.bf16.msrb.mxu1 %v705_v16 }
  0x16   :  { %282 = vmatpush.bf16.msra.mxu2 %v677_v30 }
  0x17   :  { %301 = vmatpush.bf16.msra.mxu3 %v685_v31 }
  0x19   :  { %391 = vmatpush.bf16.msrb.mxu0 %v696_v42  ;;  %484 = vmatpush.bf16.msrb.mxu1 %v704_v17  ;;  %v699_v42 = vld [vmem:[%s922_s7 + $0x8] sm:$0xff] }
  0x1a   :  { %283 = vmatpush.bf16.msra.mxu2 %v676_v32 }
  0x1b   :  { %302 = vmatpush.bf16.msra.mxu3 %v684_v33 }
  0x1d   :  { %392 = vmatpush.bf16.msrb.mxu0 %v695_v45  ;;  %485 = vmatpush.bf16.msrb.mxu1 %v703_v19  ;;  %v711_v45 = vld [vmem:[%s921_s6] ss:$0 sm:$0xff] }
  0x1e   :  { %284 = vmatpush.bf16.msra.mxu2 %v675_v34 }
  0x1f   :  { %303 = vmatpush.bf16.msra.mxu3 %v683_v35 }
  0x21   :  { %393 = vmatpush.bf16.msrb.mxu0 %v694_v52  ;;  %486 = vmatpush.bf16.msrb.mxu1 %v702_v25 }
  0x22   :  { %285 = vmatpush.bf16.msra.mxu2 %v674_v36 }
  0x23   :  { %304 = vmatpush.bf16.msra.mxu3 %v682_v37 }
  0x24   :  { %541 = vmatmul.msk.bf16.gmra.mxu0 %vm79_vm2, %v54_v29  ;;  %543 = vmatmul.msk.bf16.gmra.mxu1 %vm79_vm2, %v54_v29  ;;  %v701_v29 = vld [vmem:[%s922_s7 + $0x18] sm:$0xff] }
  0x25   :  { %394 = vmatpush.bf16.msrb.mxu0 %v693_v9  ;;  %487 = vmatpush.bf16.msrb.mxu1 %v701_v29 }
  0x29   :  { %395 = vmatpush.bf16.msrb.mxu0 %v692_v10 }
  0x2d   :  { %396 = vmatpush.bf16.msrb.mxu0 %v691_v11 }
  0x31   :  { %397 = vmatpush.bf16.msrb.mxu0 %v690_v12 }
  0x91   :  { %v105_v40 = vpop.f32.mrf.mxu0  ;;  %v124_v41 = vpop.f32.mrf.mxu1 }
  0x92   :  { %v106_v46 = vadd.f32 %v105_v40, %v60_v43  ;;  %v125_v47 = vadd.f32 %v124_v41, %v61_v44  ;;  %v700_v41 = vld [vmem:[%s922_s7 + $0x10] sm:$0xff] }
  0x93   :  { %488 = vmatpush.bf16.msrb.mxu1 %v700_v41 }
  0x94   :  { %v134_v53 = vmax.f32 %v106_v46, 0.0  ;;  %v135_v54 = vmax.f32 %v125_v47, 0.0 }
  0x97   :  { %489 = vmatpush.bf16.msrb.mxu1 %v699_v42 }
  0x99   :  { %v107_v48 = vpop.f32.mrf.mxu0  ;;  %v126_v49 = vpop.f32.mrf.mxu1 }
  0x9a   :  { %v108_v50 = vadd.f32 %v107_v48, %v60_v43  ;;  %v127_v51 = vadd.f32 %v126_v49, %v61_v44 }
  0x9c   :  { %v136_v55 = vmax.f32 %v108_v50, 0.0  ;;  %v137_v56 = vmax.f32 %v127_v51, 0.0 }
  0x9e   :  { %v142_v57 = vpack.c.bf16 %v136_v55, %v134_v53  ;;  %v143_v58 = vpack.c.bf16 %v137_v56, %v135_v54 }
  0xa0   :  { %286 = vmatmul.bf16.vlgmr.msra.gmra.mxu2 %v142_v57  ;;  %305 = vmatmul.bf16.vlgmr.msra.gmra.mxu3 %v143_v58 }
  0xa1   :  { %v110_v59 = vpop.f32.mrf.mxu0  ;;  %v129_v60 = vpop.f32.mrf.mxu1 }
  0xa2   :  { %v111_v61 = vadd.f32 %v110_v59, %v60_v43  ;;  %v130_v62 = vadd.f32 %v129_v60, %v61_v44  ;;  %v712_v59 = vld [vmem:[%s923_s8] ss:$0 sm:$0xff] }
  0xa4   :  { %v138_v3 = vmax.f32 %v111_v61, 0.0  ;;  %v139_v4 = vmax.f32 %v130_v62, 0.0 }
  0xa9   :  { %v112_v63 = vpop.f32.mrf.mxu0  ;;  %v131_v0 = vpop.f32.mrf.mxu1 }
  0xaa   :  { %v113_v1 = vadd.f32 %v112_v63, %v60_v43  ;;  %v132_v2 = vadd.f32 %v131_v0, %v61_v44  ;;  %v698_v43 = vld [vmem:[%s922_s7] sm:$0xff] }
  0xab   :  { %490 = vmatpush.bf16.msrb.mxu1 %v698_v43 }
  0xac   :  { %v140_v5 = vmax.f32 %v113_v1, 0.0  ;;  %v141_v6 = vmax.f32 %v132_v2, 0.0 }
  0xae   :  { %v144_v7 = vpack.c.bf16 %v140_v5, %v138_v3  ;;  %v145_v8 = vpack.c.bf16 %v141_v6, %v139_v4 }
  0xb0   :  { %291 = vmatmul.bf16.gmra.mxu2 %v144_v7  ;;  %310 = vmatmul.bf16.gmra.mxu3 %v145_v8 }
 0x123   :  { %v287_v13 = vpop.f32.mrf.mxu2  ;;  %v306_v14 = vpop.f32.mrf.mxu3 }
 0x124   :  { %v288_v18 = vadd.f32 %v710_v15, %v287_v13 }
 0x126   :  { %v307_v22 = vadd.f32 %v306_v14, %v288_v18 }
 0x128   :  { %v316_v26 = vmax.f32 %v307_v22, 0.0 }
 0x12b   :  { %v289_v20 = vpop.f32.mrf.mxu2  ;;  %v308_v21 = vpop.f32.mrf.mxu3 }
 0x12c   :  { %v290_v23 = vadd.f32 %v710_v15, %v289_v20 }
 0x12e   :  { %v309_v24 = vadd.f32 %v308_v21, %v290_v23 }
 0x130   :  { %v317_v27 = vmax.f32 %v309_v24, 0.0 }
 0x132   :  { %v320_v28 = vpack.c.bf16 %v317_v27, %v316_v26 }
 0x133   :  { %v292_v30 = vpop.f32.mrf.mxu2  ;;  %v311_v31 = vpop.f32.mrf.mxu3 }
 0x134   :  { %398 = vmatmul.bf16.vlgmr.msrb.gmra.mxu0 %v320_v28  ;;  %v293_v32 = vadd.f32 %v710_v15, %v292_v30 }
 0x136   :  { %v312_v34 = vadd.f32 %v311_v31, %v293_v32 }
 0x138   :  { %v318_v38 = vmax.f32 %v312_v34, 0.0 }
 0x13b   :  { %v294_v33 = vpop.f32.mrf.mxu2  ;;  %v313_v36 = vpop.f32.mrf.mxu3 }
 0x13c   :  { %v295_v35 = vadd.f32 %v710_v15, %v294_v33 }
 0x13e   :  { %v314_v37 = vadd.f32 %v313_v36, %v295_v35 }
 0x140   :  { %v319_v39 = vmax.f32 %v314_v37, 0.0 }
 0x142   :  { %v321_v40 = vpack.c.bf16 %v319_v39, %v318_v38 }
 0x144   :  { %403 = vmatmul.bf16.gmra.mxu0 %v321_v40 }
 0x1b1   :  { %v399_v44 = vpop.f32.mrf.mxu0 }
 0x1b2   :  { %v400_v46 = vadd.f32 %v711_v45, %v399_v44 }
 0x1b4   :  { %v409_v49 = vmax.f32 %v400_v46, 0.0 }
 0x1b9   :  { %v401_v47 = vpop.f32.mrf.mxu0 }
 0x1ba   :  { %v402_v48 = vadd.f32 %v711_v45, %v401_v47 }
 0x1bc   :  { %v410_v50 = vmax.f32 %v402_v48, 0.0 }
 0x1be   :  { %v413_v51 = vpack.c.bf16 %v410_v50, %v409_v49 }
 0x1c0   :  { %491 = vmatmul.bf16.vlgmr.msrb.gmra.mxu1 %v413_v51 }
 0x1c1   :  { %v404_v52 = vpop.f32.mrf.mxu0 }
 0x1c2   :  { %v405_v53 = vadd.f32 %v711_v45, %v404_v52 }
 0x1c4   :  { %v411_v56 = vmax.f32 %v405_v53, 0.0 }
 0x1c9   :  { %v406_v54 = vpop.f32.mrf.mxu0 }
 0x1ca   :  { %v407_v55 = vadd.f32 %v711_v45, %v406_v54 }
 0x1cc   :  { %v412_v57 = vmax.f32 %v407_v55, 0.0 }
 0x1ce   :  { %v414_v58 = vpack.c.bf16 %v412_v57, %v411_v56 }
 0x1d0   :  { %496 = vmatmul.bf16.gmra.mxu1 %v414_v58 }
 0x23d   :  { %v492_v60 = vpop.f32.mrf.mxu1 }
 0x23e   :  { %v493_v61 = vadd.f32 %v712_v59, %v492_v60 }
 0x240   :  { %v502_v62 = vsub.f32 0.0, %v493_v61 }
 0x242   :  { %v506_v63 = vmul.f32 1.442695, %v502_v62 }
 0x244   :  { %713 = vpow2.f32 %v506_v63 }
 0x245   :  { %v494_v0 = vpop.f32.mrf.mxu1 }
 0x246   :  { %v495_v1 = vadd.f32 %v712_v59, %v494_v0 }
 0x248   :  { %v503_v2 = vsub.f32 0.0, %v495_v1 }
 0x24a   :  { %v714_v3 = vpop.eup %713  ;;  %v508_v4 = vmul.f32 1.442695, %v503_v2 }
 0x24b   :  { %v514_v5 = vadd.f32 1.0, %v714_v3 }
 0x24c   :  { %715 = vpow2.f32 %v508_v4 }
 0x24d   :  { %717 = vrcp.f32 %v514_v5  ;;  %v497_v6 = vpop.f32.mrf.mxu1 }
 0x24e   :  { %v498_v7 = vadd.f32 %v712_v59, %v497_v6 }
 0x250   :  { %v504_v8 = vsub.f32 0.0, %v498_v7 }
 0x252   :  { %v716_v9 = vpop.eup %715  ;;  %v510_v10 = vmul.f32 1.442695, %v504_v8 }
 0x253   :  { %v718_v11 = vpop.eup %717  ;;  %v515_v12 = vadd.f32 1.0, %v716_v9 }
 0x254   :  { %523 = vst.msk [vmem:[%s924_s9] sm:$0xff] %vm522_vm3, %v718_v11  ;;  %719 = vpow2.f32 %v510_v10 }
 0x255   :  { %721 = vrcp.f32 %v515_v12  ;;  %v499_v13 = vpop.f32.mrf.mxu1 }
 0x256   :  { %v500_v14 = vadd.f32 %v712_v59, %v499_v13 }
 0x258   :  { %v505_v15 = vsub.f32 0.0, %v500_v14 }
 0x25a   :  { %v720_v16 = vpop.eup %719  ;;  %v512_v17 = vmul.f32 1.442695, %v505_v15 }
 0x25b   :  { %v722_v18 = vpop.eup %721  ;;  %v516_v19 = vadd.f32 1.0, %v720_v16 }
 0x25c   :  { %524 = vst.msk [vmem:[%s924_s9 + $0x8] sm:$0xff] %vm522_vm3, %v722_v18  ;;  %723 = vpow2.f32 %v512_v17 }
 0x25d   :  { %725 = vrcp.f32 %v516_v19 }
 0x262   :  { %v724_v20 = vpop.eup %723 }
 0x263   :  { %v726_v21 = vpop.eup %725  ;;  %v517_v22 = vadd.f32 1.0, %v724_v20 }
 0x264   :  { %525 = vst.msk [vmem:[%s924_s9 + $0x10] sm:$0xff] %vm522_vm3, %v726_v21 }
 0x265   :  { %727 = vrcp.f32 %v517_v22 }
 0x26b   :  { %v728_v23 = vpop.eup %727 }
 0x26c   :  { %526 = vst.msk [vmem:[%s924_s9 + $0x18] sm:$0xff] %vm522_vm3, %v728_v23 }
 0x26d   :  { %531 = vsyncpa [#allocation3], 1 }

</bundles_post_ra>
